<compile_context>
chip_gen: v7x
topology: tpu7x:2x2x1
jax: 0.10.0
libtpu: 0.0.40
codegen_flags: <defaults>
</compile_context>

<pallas_src>
import jax
import jax.numpy as jnp
from jax.experimental import pallas as pl
from jax.experimental.pallas import tpu as pltpu


def _mul_kernel(a_ref, b_ref, o_ref):
    # Elementwise multiply on the VPU over the whole VMEM tile.
    o_ref[...] = a_ref[...] * b_ref[...]


def _tpu_params():
    """Return (tensorcores_per_chip, vmem_bytes_per_core); conservative fallback."""
    n_tc, vmem = 1, 128 << 20
    try:
        kind = jax.devices()[0].device_kind.lower()
        if "v7" in kind:
            n_tc = 2
    except Exception:
        pass
    try:
        vmem = int(pltpu.get_tpu_info().vmem_capacity_bytes)
    except Exception:
        pass
    if vmem <= (64 << 20):  # 64 MiB/core VMEM also implies v7x-class hardware
        n_tc = max(n_tc, 2)
    return n_tc, vmem


def _pick_lane_layout(size, sub, max_lane=8192):
    """Pick (rows, L): L a multiple-of-128 divisor of size, preferring rows % sub == 0.

    Returns (0, 0) if size is not a multiple of 128 (caller uses the 1-D ragged path).
    """
    if size % 128 != 0:
        return 0, 0
    best = 0
    cand = min(max_lane, size)
    cand -= cand % 128
    while cand >= 128:
        if size % cand == 0:
            if best == 0:
                best = cand                   # largest multiple-of-128 divisor
            if (size // cand) % sub == 0:
                return size // cand, cand     # largest with sublane-aligned rows
        cand -= 128
    return size // best, best


def mul_layer(a, b):
    """Elementwise a * b (same semantics as torch.Tensor.mul for equal shapes/dtypes)."""
    # TODO(synk): broadcasting / dtype promotion of torch.Tensor.mul not implemented.
    assert a.shape == b.shape, "this kernel implements same-shape mul"
    assert a.dtype == b.dtype
    orig_shape = a.shape

    # Degenerate inputs (scalars / empty): no kernel launch needed.
    if a.ndim == 0 or a.size == 0:
        return (a * b).astype(a.dtype)

    size = int(a.size)
    itemsize = jnp.dtype(a.dtype).itemsize
    sub = max(8, 32 // itemsize)  # native sublane multiple: 8 (f32), 16 (bf16), 32 (int8)
    total_bytes = size * itemsize

    n_tc, _vmem_bytes = _tpu_params()
    if n_tc >= 2:
        # v7x: 2 TensorCores share the HBM stream; only 64 MiB VMEM per TC.
        target_tile_bytes = 4 << 20   # ~4 MiB per buffer
        vmem_cap = 40 << 20
        min_steps = 8                 # give both TCs work on the "parallel" axis
    else:
        # v5e / v6e: single TC, 128 MiB VMEM -> fewer, bigger steps win.
        target_tile_bytes = 8 << 20   # ~8 MiB per buffer
        vmem_cap = 96 << 20
        min_steps = 1

    target_elems = max(1024, target_tile_bytes // itemsize)

    rows, L = _pick_lane_layout(size, sub)
    if L:
        # Lane-dense 2-D path: (rows, L), L a big multiple of 128. Free reshape
        # of contiguous arrays; contiguous row blocks map to linear DMAs.
        a2, b2 = a.reshape(rows, L), b.reshape(rows, L)
        max_tr = max(sub, (target_elems // L) // sub * sub)
        tr = min(rows, max_tr)
        if min_steps > 1 and total_bytes > (1 << 20):
            # v7x: guarantee enough grid steps that both TensorCores stream data.
            want = min(min_steps, pl.cdiv(rows, sub))
            if pl.cdiv(rows, tr) < want:
                tr_alt = max(sub, (rows // want) // sub * sub)
                if tr_alt < tr:
                    tr = tr_alt
        grid = (pl.cdiv(rows, tr),)   # ragged last block masked by Pallas
        block_shape = (tr, L)
        index_map = lambda i: (i, 0)
        flat_shape = (rows, L)
        tile_elems = tr * L
    else:
        # Ragged 1-D path (size not a multiple of 128): full 128-lane density,
        # large multiple-of-1024 blocks, Pallas masks the final partial block.
        a2, b2 = a.reshape(size), b.reshape(size)
        bl = max(1024, (target_elems // 1024) * 1024)
        if min_steps > 1 and total_bytes > (1 << 20):
            want = min(min_steps, pl.cdiv(size, 1024))
            bl_alt = max(1024, (size // want) // 1024 * 1024)
            if bl_alt < bl:
                bl = bl_alt
        if bl >= size:
            bl = size                 # full-extent block is legal for any size
        grid = (pl.cdiv(size, bl),)
        block_shape = (bl,)
        index_map = lambda i: (i,)
        flat_shape = (size,)
        tile_elems = bl

    # VMEM budget: 2-deep pipelining of 3 arrays (~2x3x tile) plus ~50% compiler
    # headroom, clamped to the per-generation cap.
    tile_bytes = tile_elems * itemsize
    vmem_limit = int(min(vmem_cap, max(16 << 20, 3 * 3 * tile_bytes)))

    out = pl.pallas_call(
        _mul_kernel,
        out_shape=jax.ShapeDtypeStruct(flat_shape, a.dtype),
        grid_spec=pltpu.PrefetchScalarGridSpec(
            num_scalar_prefetch=0,
            grid=grid,
            in_specs=[
                pl.BlockSpec(block_shape, index_map),
                pl.BlockSpec(block_shape, index_map),
            ],
            out_specs=pl.BlockSpec(block_shape, index_map),
        ),
        compiler_params=pltpu.CompilerParams(
            dimension_semantics=("parallel",),
            vmem_limit_bytes=vmem_limit,
        ),
        cost_estimate=pl.CostEstimate(
            flops=size, transcendentals=0, bytes_accessed=3 * total_bytes
        ),
    )(a2, b2)

    # Restore the original (NCHW) shape; again a free reshape.
    return out.reshape(orig_shape)


if __name__ == "__main__":
    key = jax.random.PRNGKey(0)
    ka, kb = jax.random.split(key)
    # Small NCHW inputs: batch=2, channels=4, spatial=16x16.
    a = jax.random.normal(ka, (2, 4, 16, 16), dtype=jnp.float32)
    b = jax.random.normal(kb, (2, 4, 16, 16), dtype=jnp.float32)

    out = mul_layer(a, b)
    jax.block_until_ready(out)

    ref = a * b
    assert out.shape == ref.shape
    assert jnp.allclose(out, ref, atol=1e-6, rtol=1e-6)
    print("KERNEL_OK")
</pallas_src>

<mosaic_0001>
module attributes {stable_mosaic.version = 11 : i64} {
  func.func @_mul_kernel(%arg0: i32, %arg1: memref<8x256xf32, #tpu.memory_space<vmem>>, %arg2: memref<8x256xf32, #tpu.memory_space<vmem>>, %arg3: memref<8x256xf32, #tpu.memory_space<vmem>>) attributes {dimension_semantics = [#tpu.dimension_semantics<parallel>], iteration_bounds = array<i64: 1>, scalar_prefetch = 0 : i64, scratch_operands = 0 : i64, tpu.core_type = #tpu.core_type<tc>, window_params = [{transform_indices = @transform_0, window_bounds = array<i64: 8, 256>}, {transform_indices = @transform_1, window_bounds = array<i64: 8, 256>}, {transform_indices = @transform_2, window_bounds = array<i64: 8, 256>}]} {
    %c0 = arith.constant 0 : index
    %c0_0 = arith.constant 0 : index
    %0 = vector.load %arg1[%c0, %c0_0] : memref<8x256xf32, #tpu.memory_space<vmem>>, vector<8x256xf32>
    %c0_1 = arith.constant 0 : index
    %c0_2 = arith.constant 0 : index
    %1 = vector.load %arg2[%c0_1, %c0_2] : memref<8x256xf32, #tpu.memory_space<vmem>>, vector<8x256xf32>
    %2 = arith.mulf %0, %1 : vector<8x256xf32>
    %c0_3 = arith.constant 0 : index
    %c0_4 = arith.constant 0 : index
    %3 = vector.load %arg3[%c0_3, %c0_4] : memref<8x256xf32, #tpu.memory_space<vmem>>, vector<8x256xf32>
    tpu.vector_store %arg3[%c0_3, %c0_4], %2 {strides = array<i32>} : memref<8x256xf32, #tpu.memory_space<vmem>>, vector<8x256xf32>,
    return
  }
  func.func @transform_0(%arg0: i32) -> (i32, i32) {
    %c0_i32 = arith.constant 0 : i32
    %c0_i32_0 = arith.constant 0 : i32
    return %arg0, %c0_i32 : i32, i32
  }
  func.func @transform_1(%arg0: i32) -> (i32, i32) {
    %c0_i32 = arith.constant 0 : i32
    %c0_i32_0 = arith.constant 0 : i32
    return %arg0, %c0_i32 : i32, i32
  }
  func.func @transform_2(%arg0: i32) -> (i32, i32) {
    %c0_i32 = arith.constant 0 : i32
    %c0_i32_0 = arith.constant 0 : i32
    return %arg0, %c0_i32 : i32, i32
  }
}

</mosaic_0001>

<bundles_post_ra>
// kernel: tpu_custom_call.1
= control target key start
LH: loop header
LB: loop body
LE: loop exit
PB: predicated region body
PF: predicated region fallthrough
CT: control target
= control target key end

     0   :  { %7 = vsyncpa [#allocation3], 0  ;;  %s189_s0 = inlined_call_operand.hbm [shape: f32[8,256], index: 0, kind: input, shape index: {}]   ;;  %s190_s1 = inlined_call_operand.hbm [shape: f32[8,256], index: 1, kind: input, shape index: {}]   ;;  %s191_s2 = inlined_call_operand.hbm [shape: f32[8,256], index: 2, kind: output, shape index: {}]  }
   0x1   :  { %8 = vsyncpa [#allocation6], 0 }
   0x2   :  { %9 = vsyncpa [#allocation4], 0  ;;  %s135_s9 = smov [#allocation2]   ;;  %s136_s11 = smov [#allocation5]  }
   0x3   :  { %s16_s10 = sshll.u32 %s135_s9, 4  ;;  %s26_s12 = sshll.u32 %s136_s11, 4  ;;  %s17_s10 = int_to_ptr.vmem [resolvable:$true] %s16_s10  ;;  %s27_s12 = int_to_ptr.vmem [resolvable:$true] %s26_s12 }
   0x4   :  { %s63_s15 = scalar_lea.hbm %s189_s0, 256 }
   0x5   :  { %p64_p0 = scmp.ne.s32.totalorder %s189_s0, %s63_s15  ;;  %p67_p1 = scmp.lt.u32.totalorder %s63_s15, %s189_s0 }
   0x7   :  { %p69_p2 = pnand %p67_p1, %p64_p0 }
   0x9   :  { %72 = shalt.err (!%p69_p2)
}
   0xa   :  { %s73_s20 = scalar_lea.vmem %s17_s10, 256  ;;  %p78_p4 = scmp.lt.s32.totalorder %s17_s10, %s17_s10 }
   0xb   :  { %p74_p3 = scmp.ne.s32.totalorder %s17_s10, %s73_s20  ;;  %p79_p5 = scmp.lt.s32.totalorder %s73_s20, %s73_s20 }
   0xd   :  { %p80_p6 = por %p79_p5, %p78_p4 }
   0xf   :  { %p81_p7 = pnand %p80_p6, %p74_p3 }
  0x11   :  { %84 = shalt.err (!%p81_p7)
}
  0x12   :  { %19 = dma.hbm_to_vmem [thread:$0]  %s189_s0, 256, %s17_s10, [#allocation3]  }
  0x13   :  { %s85_s25 = scalar_lea.hbm %s190_s1, 256 }
  0x14   :  { %p86_p8 = scmp.ne.s32.totalorder %s190_s1, %s85_s25  ;;  %p89_p9 = scmp.lt.u32.totalorder %s85_s25, %s190_s1 }
  0x16   :  { %p91_p10 = pnand %p89_p9, %p86_p8 }
  0x18   :  { %94 = shalt.err (!%p91_p10)
}
  0x19   :  { %s95_s30 = scalar_lea.vmem %s27_s12, 256  ;;  %p100_p12 = scmp.lt.s32.totalorder %s27_s12, %s27_s12 }
  0x1a   :  { %p96_p11 = scmp.ne.s32.totalorder %s27_s12, %s95_s30  ;;  %p101_p13 = scmp.lt.s32.totalorder %s95_s30, %s95_s30 }
  0x1c   :  { %p102_p0 = por %p101_p13, %p100_p12 }
  0x1e   :  { %p103_p1 = pnand %p102_p0, %p96_p11 }
  0x20   :  { %106 = shalt.err (!%p103_p1)
}
  0x21   :  { %29 = dma.hbm_to_vmem [thread:$0]  %s190_s1, 256, %s27_s12, [#allocation6]  }
  0x22   :  { %129 = dma.done.wait [#allocation3], 256  }
  0x23   :  { %130 = vsyncadd [#allocation3], 4294967040 }
  0x24   :  { %131 = dma.done.wait [#allocation6], 256  }
  0x25   :  { %132 = vsyncadd [#allocation6], 4294967040  ;;  %s137_s4 = smov [#allocation7]   ;;  %v36_v0 = vld [vmem:[#allocation2] sm:$0xff]  ;;  %v38_v1 = vld [vmem:[#allocation5] sm:$0xff] }
  0x26   :  { %s50_s5 = sshll.u32 %s137_s4, 4  ;;  %v37_v2 = vld [vmem:[#allocation2 + $0x8] sm:$0xff]  ;;  %v40_v3 = vmul.f32 %v38_v1, %v36_v0  ;;  %v39_v4 = vld [vmem:[#allocation5 + $0x8] sm:$0xff]  ;;  %s51_s5 = int_to_ptr.vmem [resolvable:$true] %s50_s5 }
  0x27   :  { %v41_v5 = vmul.f32 %v39_v4, %v37_v2  ;;  %s107_s6 = scalar_lea.vmem %s51_s5, 256  ;;  %p112_p3 = scmp.lt.s32.totalorder %s51_s5, %s51_s5 }
  0x28   :  { %42 = vst [vmem:[#allocation7] sm:$0xff] %v40_v3  ;;  %p108_p2 = scmp.ne.s32.totalorder %s51_s5, %s107_s6  ;;  %p113_p4 = scmp.lt.s32.totalorder %s107_s6, %s107_s6 }
  0x29   :  { %43 = vst [vmem:[#allocation7 + $0x8] sm:$0xff] %v41_v5 }
  0x2a   :  { %p114_p5 = por %p113_p4, %p112_p3 }
  0x2c   :  { %p115_p6 = pnand %p114_p5, %p108_p2 }
  0x2e   :  { %118 = shalt.err (!%p115_p6)
}
  0x2f   :  { %s119_s8 = scalar_lea.hbm %s191_s2, 256 }
  0x30   :  { %p120_p7 = scmp.ne.s32.totalorder %s191_s2, %s119_s8  ;;  %p123_p8 = scmp.lt.u32.totalorder %s119_s8, %s191_s2 }
  0x32   :  { %p125_p9 = pnand %p123_p8, %p120_p7 }
  0x34   :  { %128 = shalt.err (!%p125_p9)
}
  0x35   :  { %53 = dma.vmem_to_hbm [thread:$0]  %s51_s5, 256, %s191_s2, [#allocation4]  }
  0x36   :  { %133 = dma.done.wait [#allocation4], 256  }
  0x37   :  { %134 = vsyncadd [#allocation4], 4294967040 }
  0x38   :  { %57 = vsyncpa [#allocation3], 1 }
  0x39   :  { %58 = vsyncpa [#allocation6], 1 }
  0x3a   :  { %59 = vsyncpa [#allocation4], 1 }

</bundles_post_ra>
